<compile_context>
chip_gen: v5e
topology: v5e:2x2
jax: 0.10.0
libtpu: 0.0.40
codegen_flags: <defaults>
</compile_context>

<pallas_src>
import functools

import jax
import jax.numpy as jnp
from jax.experimental import pallas as pl
from jax.experimental.pallas import tpu as pltpu

_NEG = -1e9  # additive mask value for non-edges


def _gat_fused_kernel(x_ref, bias_ref, w1_ref, b1_ref, w2_ref, b2_ref, out_ref,
                      *, c1, c2):
    """Both GAT layers in one program; everything stays VMEM-resident."""
    bias = bias_ref[...].astype(jnp.float32)            # [N, N]: 0 / -1e9 (dst, src)

    def layer(x_bf16, w_ref, b_ref, c):
        # Single fused MXU pass: columns = [Ws | Wl | Ws@att_s^T | Wd@att_d^T]
        z = jnp.dot(x_bf16, w_ref[...], preferred_element_type=jnp.float32)  # [N, 2c+2]
        h_src = z[:, :c]                                 # [N, c]  messages
        lin = z[:, c:2 * c]                              # [N, c]  skip branch x@Wl
        a_src = z[:, 2 * c:2 * c + 1]                    # [N, 1]
        a_dst = z[:, 2 * c + 1:2 * c + 2]                # [N, 1]

        # e[i, j] = leaky_relu(a_dst[i] + a_src[j], 0.2) + mask_bias[i, j]
        e = a_dst + jnp.transpose(a_src)                 # [N, N] (tiny [N,1] XLU move)
        e = jnp.maximum(e, 0.2 * e)                      # leaky-ReLU via max
        e = e + bias                                     # additive edge mask

        # Masked softmax over incoming edges (src axis). Clamp the row max so
        # isolated rows (max == -1e9) underflow to alpha == 0 (PyG semantics:
        # nodes with no incoming edge get only the bias / skip contribution).
        m = jnp.maximum(jnp.max(e, axis=-1, keepdims=True), -1e4)
        p = jnp.exp(e - m)                               # non-edges underflow to 0
        denom = jnp.sum(p, axis=-1, keepdims=True)
        alpha = p * pl.reciprocal(denom + 1e-16, approx=True)   # EUP reciprocal

        conv = jnp.dot(alpha.astype(jnp.bfloat16), h_src.astype(jnp.bfloat16),
                       preferred_element_type=jnp.float32)
        return conv + lin + b_ref[...]                   # b = b_conv + b_lin

    y1 = layer(x_ref[...], w1_ref, b1_ref, c1)           # layer 1
    y1 = jnp.maximum(y1, 0.0)                            # ReLU
    y2 = layer(y1.astype(jnp.bfloat16), w2_ref, b2_ref, c2)
    out_ref[...] = y2.astype(out_ref.dtype)


def _pack_layer(ws, wd, att_s, att_d, b_conv, wl, b_lin):
    # Fold per-node attention logits into the weight-concat matmul:
    #   a_src = (x @ Ws) @ att_s^T = x @ (Ws @ att_s^T)   (same for a_dst)
    wa_s = ws @ att_s.T                                   # [Fin, 1]
    wa_d = wd @ att_d.T                                   # [Fin, 1]
    w_cat = jnp.concatenate([ws, wl, wa_s, wa_d], axis=1).astype(jnp.bfloat16)
    b = (b_conv + b_lin).astype(jnp.float32)              # combined layer bias
    return w_cat, b


def gat_forward(x, adj, params):
    n = x.shape[0]
    hidden = params["ws1"].shape[1]
    out_c = params["ws2"].shape[1]

    w1, b1 = _pack_layer(params["ws1"], params["wd1"], params["att_s1"],
                         params["att_d1"], params["b_conv1"],
                         params["wl1"], params["b_lin1"])
    w2, b2 = _pack_layer(params["ws2"], params["wd2"], params["att_s2"],
                         params["att_d2"], params["b_conv2"],
                         params["wl2"], params["b_lin2"])

    # Additive softmax mask (bf16 halves the only O(N^2) input's HBM/VMEM bytes).
    adj_bias = jnp.where(adj > 0.0, 0.0, _NEG).astype(jnp.bfloat16)
    x_bf16 = x.astype(jnp.bfloat16)

    vmem = pl.BlockSpec(memory_space=pltpu.MemorySpace.VMEM)
    kernel = functools.partial(_gat_fused_kernel, c1=hidden, c2=out_c)
    # TODO(synk): for large N, add a dst-row grid (BlockSpec((TILE_DST, N)) on
    # mask/output, "parallel" dimension_semantics for v7x's 2 TCs, online
    # softmax over src blocks). At N=16 a single whole-resident program wins.
    return pl.pallas_call(
        kernel,
        out_shape=jax.ShapeDtypeStruct((n, out_c), jnp.float32),
        in_specs=[vmem] * 6,
        out_specs=vmem,
    )(x_bf16, adj_bias, w1, b1, w2, b2)


def init_params(key, f_in, hidden, out):
    ks = jax.random.split(key, 12)
    s = 0.1
    return {
        # conv1 (GATConv: lin_src / lin_dst have no bias; layer bias added at end)
        "ws1": s * jax.random.normal(ks[0], (f_in, hidden), jnp.float32),
        "wd1": s * jax.random.normal(ks[1], (f_in, hidden), jnp.float32),
        "att_s1": s * jax.random.normal(ks[2], (1, hidden), jnp.float32),
        "att_d1": s * jax.random.normal(ks[3], (1, hidden), jnp.float32),
        "b_conv1": jnp.zeros((1, hidden), jnp.float32),
        # lin1
        "wl1": s * jax.random.normal(ks[4], (f_in, hidden), jnp.float32),
        "b_lin1": s * jax.random.normal(ks[5], (1, hidden), jnp.float32),
        # conv2
        "ws2": s * jax.random.normal(ks[6], (hidden, out), jnp.float32),
        "wd2": s * jax.random.normal(ks[7], (hidden, out), jnp.float32),
        "att_s2": s * jax.random.normal(ks[8], (1, out), jnp.float32),
        "att_d2": s * jax.random.normal(ks[9], (1, out), jnp.float32),
        "b_conv2": jnp.zeros((1, out), jnp.float32),
        # lin2
        "wl2": s * jax.random.normal(ks[10], (hidden, out), jnp.float32),
        "b_lin2": s * jax.random.normal(ks[11], (1, out), jnp.float32),
    }


if __name__ == "__main__":
    N = 16          # nodes
    F_IN = 16       # input feature dim
    HIDDEN = 32     # hidden_channels
    OUT = 8         # out_channels

    key = jax.random.PRNGKey(0)
    kx, kp = jax.random.split(key)

    # node features [N, F_IN]
    x = jax.random.normal(kx, (N, F_IN), jnp.float32)

    # deterministic edge_index [2, E]: edges i -> (i+1)%N, (i+3)%N, (i+7)%N
    src = jnp.concatenate([jnp.arange(N)] * 3)
    dst = jnp.concatenate([(jnp.arange(N) + o) % N for o in (1, 3, 7)])
    edge_index = jnp.stack([src, dst], axis=0).astype(jnp.int32)   # [2, 48]

    # dense adjacency mask adj[dst, src] = 1.0 (glue, plain JAX)
    adj = jnp.zeros((N, N), jnp.float32).at[edge_index[1], edge_index[0]].set(1.0)

    params = init_params(kp, F_IN, HIDDEN, OUT)

    out = gat_forward(x, adj, params)
    out = jax.block_until_ready(out)
    assert out.shape == (N, OUT) and bool(jnp.all(jnp.isfinite(out)))
    print("KERNEL_OK")
</pallas_src>

<mosaic_0001>
module attributes {stable_mosaic.version = 11 : i64} {
  func.func @_gat_fused_kernel(%arg0: memref<16x16xbf16, #tpu.memory_space<vmem>>, %arg1: memref<16x16xbf16, #tpu.memory_space<vmem>>, %arg2: memref<16x66xbf16, #tpu.memory_space<vmem>>, %arg3: memref<1x32xf32, #tpu.memory_space<vmem>>, %arg4: memref<32x18xbf16, #tpu.memory_space<vmem>>, %arg5: memref<1x8xf32, #tpu.memory_space<vmem>>, %arg6: memref<16x8xf32, #tpu.memory_space<vmem>>) attributes {dimension_semantics = [], scalar_prefetch = 0 : i64, scratch_operands = 0 : i64, tpu.core_type = #tpu.core_type<tc>} {
    %c0 = arith.constant 0 : index
    %c0_0 = arith.constant 0 : index
    %0 = vector.load %arg1[%c0, %c0_0] : memref<16x16xbf16, #tpu.memory_space<vmem>>, vector<16x16xbf16>
    %1 = arith.extf %0 : vector<16x16xbf16> to vector<16x16xf32>
    %c0_1 = arith.constant 0 : index
    %c0_2 = arith.constant 0 : index
    %2 = vector.load %arg0[%c0_1, %c0_2] : memref<16x16xbf16, #tpu.memory_space<vmem>>, vector<16x16xbf16>
    %c0_3 = arith.constant 0 : index
    %c0_4 = arith.constant 0 : index
    %3 = vector.load %arg2[%c0_3, %c0_4] : memref<16x66xbf16, #tpu.memory_space<vmem>>, vector<16x66xbf16>
    %cst = arith.constant dense<0.000000e+00> : vector<16x66xf32>
    %4 = tpu.matmul %2, %3, %cst {dimension_numbers = #tpu.dot_dimension_numbers<[1], [0], [0], [1], [0, 0, 1, 1], [], []>} : vector<16x16xbf16>, vector<16x66xbf16>, vector<16x66xf32> -> vector<16x66xf32>
    %5 = vector.extract_strided_slice %4 {offsets = [0, 0], sizes = [16, 32], strides = [1, 1]} : vector<16x66xf32> to vector<16x32xf32>
    %6 = vector.extract_strided_slice %4 {offsets = [0, 32], sizes = [16, 32], strides = [1, 1]} : vector<16x66xf32> to vector<16x32xf32>
    %7 = vector.extract_strided_slice %4 {offsets = [0, 64], sizes = [16, 1], strides = [1, 1]} : vector<16x66xf32> to vector<16x1xf32>
    %8 = vector.extract_strided_slice %4 {offsets = [0, 65], sizes = [16, 1], strides = [1, 1]} : vector<16x66xf32> to vector<16x1xf32>
    %9 = tpu.transpose %7, [1, 0] : vector<16x1xf32> -> vector<1x16xf32>
    %10 = vector.broadcast %8 : vector<16x1xf32> to vector<16x16xf32>
    %11 = vector.broadcast %9 : vector<1x16xf32> to vector<16x16xf32>
    %12 = arith.addf %10, %11 : vector<16x16xf32>
    %cst_5 = arith.constant 2.000000e-01 : f32
    %13 = vector.broadcast %cst_5 : f32 to vector<16x16xf32>
    %14 = arith.mulf %13, %12 : vector<16x16xf32>
    %15 = arith.maximumf %12, %14 : vector<16x16xf32>
    %16 = arith.addf %15, %1 : vector<16x16xf32>
    %cst_6 = arith.constant dense<0xFF800000> : vector<16xf32>
    %17 = vector.multi_reduction <maximumf>, %16, %cst_6 [1] : vector<16x16xf32> to vector<16xf32>
    %18 = vector.shape_cast %17 : vector<16xf32> to vector<16x1xf32>
    %cst_7 = arith.constant -1.000000e+04 : f32
    %19 = vector.broadcast %cst_7 : f32 to vector<16x1xf32>
    %20 = arith.maximumf %18, %19 : vector<16x1xf32>
    %21 = vector.broadcast %20 : vector<16x1xf32> to vector<16x16xf32>
    %22 = arith.subf %16, %21 : vector<16x16xf32>
    %23 = math.exp %22 : vector<16x16xf32>
    %cst_8 = arith.constant dense<0.000000e+00> : vector<16xf32>
    %24 = vector.multi_reduction <add>, %23, %cst_8 [1] : vector<16x16xf32> to vector<16xf32>
    %25 = vector.shape_cast %24 : vector<16xf32> to vector<16x1xf32>
    %cst_9 = arith.constant 1.000000e-16 : f32
    %26 = vector.broadcast %cst_9 : f32 to vector<16x1xf32>
    %27 = arith.addf %25, %26 : vector<16x1xf32>
    %28 = tpu.reciprocal %27 {approx = true} : vector<16x1xf32> -> vector<16x1xf32>
    %29 = vector.broadcast %28 : vector<16x1xf32> to vector<16x16xf32>
    %30 = arith.mulf %23, %29 : vector<16x16xf32>
    %31 = arith.truncf %30 : vector<16x16xf32> to vector<16x16xbf16>
    %32 = arith.truncf %5 : vector<16x32xf32> to vector<16x32xbf16>
    %cst_10 = arith.constant dense<0.000000e+00> : vector<16x32xf32>
    %33 = tpu.matmul %31, %32, %cst_10 {dimension_numbers = #tpu.dot_dimension_numbers<[1], [0], [0], [1], [0, 0, 1, 1], [], []>} : vector<16x16xbf16>, vector<16x32xbf16>, vector<16x32xf32> -> vector<16x32xf32>
    %34 = arith.addf %33, %6 : vector<16x32xf32>
    %c0_11 = arith.constant 0 : index
    %c0_12 = arith.constant 0 : index
    %35 = vector.load %arg3[%c0_11, %c0_12] : memref<1x32xf32, #tpu.memory_space<vmem>>, vector<1x32xf32>
    %36 = vector.broadcast %35 : vector<1x32xf32> to vector<16x32xf32>
    %37 = arith.addf %34, %36 : vector<16x32xf32>
    %cst_13 = arith.constant 0.000000e+00 : f32
    %38 = vector.broadcast %cst_13 : f32 to vector<16x32xf32>
    %39 = arith.maximumf %37, %38 : vector<16x32xf32>
    %40 = arith.truncf %39 : vector<16x32xf32> to vector<16x32xbf16>
    %c0_14 = arith.constant 0 : index
    %c0_15 = arith.constant 0 : index
    %41 = vector.load %arg4[%c0_14, %c0_15] : memref<32x18xbf16, #tpu.memory_space<vmem>>, vector<32x18xbf16>
    %cst_16 = arith.constant dense<0.000000e+00> : vector<16x18xf32>
    %42 = tpu.matmul %40, %41, %cst_16 {dimension_numbers = #tpu.dot_dimension_numbers<[1], [0], [0], [1], [0, 0, 1, 1], [], []>} : vector<16x32xbf16>, vector<32x18xbf16>, vector<16x18xf32> -> vector<16x18xf32>
    %43 = vector.extract_strided_slice %42 {offsets = [0, 0], sizes = [16, 8], strides = [1, 1]} : vector<16x18xf32> to vector<16x8xf32>
    %44 = vector.extract_strided_slice %42 {offsets = [0, 8], sizes = [16, 8], strides = [1, 1]} : vector<16x18xf32> to vector<16x8xf32>
    %45 = vector.extract_strided_slice %42 {offsets = [0, 16], sizes = [16, 1], strides = [1, 1]} : vector<16x18xf32> to vector<16x1xf32>
    %46 = vector.extract_strided_slice %42 {offsets = [0, 17], sizes = [16, 1], strides = [1, 1]} : vector<16x18xf32> to vector<16x1xf32>
    %47 = tpu.transpose %45, [1, 0] : vector<16x1xf32> -> vector<1x16xf32>
    %48 = vector.broadcast %46 : vector<16x1xf32> to vector<16x16xf32>
    %49 = vector.broadcast %47 : vector<1x16xf32> to vector<16x16xf32>
    %50 = arith.addf %48, %49 : vector<16x16xf32>
    %cst_17 = arith.constant 2.000000e-01 : f32
    %51 = vector.broadcast %cst_17 : f32 to vector<16x16xf32>
    %52 = arith.mulf %51, %50 : vector<16x16xf32>
    %53 = arith.maximumf %50, %52 : vector<16x16xf32>
    %54 = arith.addf %53, %1 : vector<16x16xf32>
    %cst_18 = arith.constant dense<0xFF800000> : vector<16xf32>
    %55 = vector.multi_reduction <maximumf>, %54, %cst_18 [1] : vector<16x16xf32> to vector<16xf32>
    %56 = vector.shape_cast %55 : vector<16xf32> to vector<16x1xf32>
    %cst_19 = arith.constant -1.000000e+04 : f32
    %57 = vector.broadcast %cst_19 : f32 to vector<16x1xf32>
    %58 = arith.maximumf %56, %57 : vector<16x1xf32>
    %59 = vector.broadcast %58 : vector<16x1xf32> to vector<16x16xf32>
    %60 = arith.subf %54, %59 : vector<16x16xf32>
    %61 = math.exp %60 : vector<16x16xf32>
    %cst_20 = arith.constant dense<0.000000e+00> : vector<16xf32>
    %62 = vector.multi_reduction <add>, %61, %cst_20 [1] : vector<16x16xf32> to vector<16xf32>
    %63 = vector.shape_cast %62 : vector<16xf32> to vector<16x1xf32>
    %cst_21 = arith.constant 1.000000e-16 : f32
    %64 = vector.broadcast %cst_21 : f32 to vector<16x1xf32>
    %65 = arith.addf %63, %64 : vector<16x1xf32>
    %66 = tpu.reciprocal %65 {approx = true} : vector<16x1xf32> -> vector<16x1xf32>
    %67 = vector.broadcast %66 : vector<16x1xf32> to vector<16x16xf32>
    %68 = arith.mulf %61, %67 : vector<16x16xf32>
    %69 = arith.truncf %68 : vector<16x16xf32> to vector<16x16xbf16>
    %70 = arith.truncf %43 : vector<16x8xf32> to vector<16x8xbf16>
    %cst_22 = arith.constant dense<0.000000e+00> : vector<16x8xf32>
    %71 = tpu.matmul %69, %70, %cst_22 {dimension_numbers = #tpu.dot_dimension_numbers<[1], [0], [0], [1], [0, 0, 1, 1], [], []>} : vector<16x16xbf16>, vector<16x8xbf16>, vector<16x8xf32> -> vector<16x8xf32>
    %72 = arith.addf %71, %44 : vector<16x8xf32>
    %c0_23 = arith.constant 0 : index
    %c0_24 = arith.constant 0 : index
    %73 = vector.load %arg5[%c0_23, %c0_24] : memref<1x8xf32, #tpu.memory_space<vmem>>, vector<1x8xf32>
    %74 = vector.broadcast %73 : vector<1x8xf32> to vector<16x8xf32>
    %75 = arith.addf %72, %74 : vector<16x8xf32>
    %c0_25 = arith.constant 0 : index
    %c0_26 = arith.constant 0 : index
    %76 = vector.load %arg6[%c0_25, %c0_26] : memref<16x8xf32, #tpu.memory_space<vmem>>, vector<16x8xf32>
    tpu.vector_store %arg6[%c0_25, %c0_26], %75 {strides = array<i32>} : memref<16x8xf32, #tpu.memory_space<vmem>>, vector<16x8xf32>,
    return
  }
}

</mosaic_0001>

<bundles_post_ra>
// kernel: tpu_custom_call.1
= control target key start
LH: loop header
LB: loop body
LE: loop exit
PB: predicated region body
PF: predicated region fallthrough
CT: control target
= control target key end

     0   :  { %v389_v1 = vmov 65   ;;  %vm43_vm0 = vcmask 130048   ;;  %s390_s25 = smov 64   ;;  %vm194_vm1 = vcmask 261120   ;;  %v392_v60 = vmov 17   ;;  %s480_s2 = inlined_call_operand.vmem [shape: bf16[16,66], index: 2, kind: input, shape index: {}]   ;;  %s481_s0 = inlined_call_operand.vmem [shape: bf16[16,16], index: 0, kind: input, shape index: {}]   ;;  %s482_s1 = inlined_call_operand.vmem [shape: bf16[16,16], index: 1, kind: input, shape index: {}]   ;;  %s483_s3 = inlined_call_operand.vmem [shape: f32[1,32], index: 3, kind: input, shape index: {}]   ;;  %s484_s4 = inlined_call_operand.vmem [shape: bf16[32,18], index: 4, kind: input, shape index: {}]   ;;  %s485_s5 = inlined_call_operand.vmem [shape: f32[1,8], index: 5, kind: input, shape index: {}]   ;;  %s486_s6 = inlined_call_operand.vmem [shape: f32[16,8], index: 6, kind: output, shape index: {}]  }
   0x1   :  { %v354_v0 = vld [vmem:[%s480_s2] sm:$0xff]  ;;  %368 = vset.pattern.permute.xlu1 %v389_v1  ;;  %v356_v46 = vld [vmem:[%s484_s4 + $0x8] sm:$0xff]  ;;  %370 = vset.pattern.permute.xlu0 %v392_v60  ;;  %vm326_vm2 = vcmask 64512  }
   0x2   :  { %v353_v2 = vld [vmem:[%s481_s0] sm:$0xff]  ;;  %54 = vmatpush.bf16.msra.mxu0 %v354_v0  ;;  %204 = vmatpush.bf16.msra.mxu2 %v356_v46 }
   0x3   :  { %v440_v12 = vld [vmem:[%s482_s1] sm:$0xff]   ;;  %s391_s1 = smov 96  }
   0x4   :  { %v360_v17 = vunpack.c.h.bf16 %v440_v12  ;;  %v359_v18 = vunpack.c.l.bf16 %v440_v12  ;;  %v355_v47 = vld [vmem:[%s484_s4] sm:$0xff]  ;;  %s393_s4 = smov 112  }
   0x5   :  { %341 = vmatmul.msk.bf16.vlgmr.msra.gmra.mxu0 %vm43_vm0, %v353_v2  ;;  %v371_v51 = vld [vmem:[%s483_s3] ss:$0 sm:$0xff]  ;;  %s394_s3 = smov 120  }
   0x6   :  { %205 = vmatpush.bf16.msra.mxu2 %v355_v47 }
  0x82   :  { %v56_v3 = vpop.f32.mrf.mxu0 }
  0x83   :  { %102 = vperm.xlu1 %368, %v56_v3   ;;  %63 = vrot.lane.b32.xlu0 %v56_v3, %s390_s25 }
  0x8a   :  { %v58_v4 = vpop.f32.mrf.mxu0 }
  0x8b   :  { %106 = vperm.xlu1 %368, %v58_v4   ;;  %65 = vrot.lane.b32.xlu0 %v58_v4, %s390_s25  ;;  %v145_v5 = vpack.c.bf16 %v58_v4, %v56_v3 }
  0x8d   :  { %162 = vmatpush.bf16.msra.mxu1 %v145_v5 }
  0x93   :  { %369 = vset.pattern.permute.xlu1 %v392_v60 }
  0xf5   :  { %v64_v6 = vpop.permute.xlu0 %63  ;;  %v103_v8 = vpop.permute.xlu1 %102 }
  0xf6   :  { %69 = vxpose.xlu2.b32.start [1/2] (short) (narrow) %v64_v6, 8 }
  0xfd   :  { %v66_v7 = vpop.permute.xlu0 %65  ;;  %v107_v11 = vpop.permute.xlu1 %106 }
  0xfe   :  { %70 = vxpose.xlu2.b32.end [2/2] (short) (narrow) %v66_v7, 8 }
 0x18f   :  { %v85_v9 = vpop.trf.xlu2 }
 0x190   :  { %v109_v10 = vperm.slane %v85_v9, 0 }
 0x192   :  { %v110_v13 = vadd.f32 %v109_v10, %v103_v8  ;;  %v111_v14 = vadd.f32 %v109_v10, %v107_v11 }
 0x194   :  { %v112_v15 = vmul.f32 0.2, %v110_v13  ;;  %v113_v16 = vmul.f32 0.2, %v111_v14 }
 0x196   :  { %v115_v19 = vmax.f32 %v111_v14, %v113_v16  ;;  %v114_v20 = vmax.f32 %v110_v13, %v112_v15 }
 0x198   :  { %v117_v21 = vadd.f32 %v360_v17, %v115_v19  ;;  %v116_v22 = vadd.f32 %v359_v18, %v114_v20 }
 0x19a   :  { %v121_v23 = vsel %vm43_vm0, %v117_v21, -inf  ;;  %v118_v24 = vsel %vm43_vm0, %v116_v22, -inf }
 0x19b   :  { %122 = vmax.xlane.f32.xlu1 %v121_v23  ;;  %119 = vmax.xlane.f32.xlu0 %v118_v24 }
 0x1b4   :  { %146 = vrot.lane.b32.xlu1 %v56_v3, %s391_s1 }
 0x20e   :  { %v123_v25 = vpop.xlane.xlu1 %122  ;;  %v120_v26 = vpop.xlane.xlu0 %119 }
 0x20f   :  { %v125_v27 = vmax.f32 %v123_v25, -10000.0  ;;  %v124_v28 = vmax.f32 %v120_v26, -10000.0 }
 0x211   :  { %v127_v29 = vsub.f32 %v117_v21, %v125_v27  ;;  %v126_v30 = vsub.f32 %v116_v22, %v124_v28 }
 0x213   :  { %v130_v31 = vmul.f32 1.442695, %v127_v29  ;;  %v128_v32 = vmul.f32 1.442695, %v126_v30 }
 0x215   :  { %373 = vpow2.f32 %v130_v31 }
 0x216   :  { %375 = vpow2.f32 %v128_v32 }
 0x21b   :  { %v374_v33 = vpop.eup %373 }
 0x21c   :  { %v376_v34 = vpop.eup %375  ;;  %v135_v35 = vsel %vm43_vm0, %v374_v33, 0.0 }
 0x21d   :  { %136 = vadd.xlane.f32.xlu0 %v135_v35  ;;  %v132_v36 = vsel %vm43_vm0, %v376_v34, 0.0 }
 0x21e   :  { %133 = vadd.xlane.f32.xlu2 %v132_v36 }
 0x226   :  { %v147_v49 = vpop.permute.xlu1 %146 }
 0x231   :  { %148 = vrot.lane.b32.xlu0 %v58_v4, %s391_s1 }
 0x290   :  { %v137_v37 = vpop.xlane.xlu0 %136 }
 0x291   :  { %v134_v38 = vpop.xlane.xlu2 %133  ;;  %v139_v39 = vadd.f32 1e-16, %v137_v37  ;;  %v372_v37 = vld [vmem:[%s485_s5] ss:$0 sm:$0xff] }
 0x292   :  { %v138_v40 = vadd.f32 1e-16, %v134_v38 }
 0x293   :  { %377 = vrcp.f32 %v139_v39 }
 0x294   :  { %379 = vrcp.f32 %v138_v40 }
 0x299   :  { %v378_v41 = vpop.eup %377 }
 0x29a   :  { %v380_v42 = vpop.eup %379  ;;  %v143_v43 = vmul.f32 %v378_v41, %v374_v33 }
 0x29b   :  { %v142_v44 = vmul.f32 %v380_v42, %v376_v34 }
 0x29d   :  { %v144_v45 = vpack.c.bf16 %v143_v43, %v142_v44 }
 0x29f   :  { %342 = vmatmul.msk.bf16.vlgmr.msra.gmra.mxu1 %vm43_vm0, %v144_v45 }
 0x2a3   :  { %v149_v52 = vpop.permute.xlu0 %148 }
 0x31c   :  { %v164_v48 = vpop.f32.mrf.mxu1 }
 0x31d   :  { %v165_v50 = vadd.f32 %v164_v48, %v147_v49 }
 0x31f   :  { %v173_v54 = vadd.f32 %v371_v51, %v165_v50 }
 0x321   :  { %v175_v57 = vmax.f32 %v173_v54, 0.0 }
 0x324   :  { %v166_v53 = vpop.f32.mrf.mxu1 }
 0x325   :  { %v167_v55 = vadd.f32 %v166_v53, %v149_v52 }
 0x327   :  { %v174_v56 = vadd.f32 %v371_v51, %v167_v55 }
 0x329   :  { %v176_v58 = vmax.f32 %v174_v56, 0.0 }
 0x32b   :  { %v177_v59 = vpack.c.bf16 %v176_v58, %v175_v57 }
 0x32d   :  { %351 = vmatmul.msk.bf16.vlgmr.msra.gmra.mxu2 %vm194_vm1, %v177_v59 }
 0x3b0   :  { %v207_v61 = vpop.f32.mrf.mxu2 }
 0x3b1   :  { %214 = vrot.lane.b32.xlu1 %v207_v61, %s393_s4 }
 0x3b8   :  { %v209_v62 = vpop.f32.mrf.mxu2 }
 0x3b9   :  { %253 = vperm.xlu1 %369, %v207_v61   ;;  %216 = vrot.lane.b32.xlu0 %v209_v62, %s393_s4  ;;  %v296_v63 = vpack.c.bf16 %v209_v62, %v207_v61 }
 0x3bb   :  { %313 = vmatpush.bf16.msra.mxu3 %v296_v63 }
 0x3c1   :  { %257 = vperm.xlu0 %370, %v209_v62  }
 0x423   :  { %v215_v0 = vpop.permute.xlu1 %214 }
 0x424   :  { %220 = vxpose.xlu1.b32.start [1/2] (short) (narrow) %v215_v0, 8 }
 0x42b   :  { %v217_v1 = vpop.permute.xlu0 %216  ;;  %v254_v2 = vpop.permute.xlu1 %253 }
 0x42c   :  { %221 = vxpose.xlu1.b32.end [2/2] (short) (narrow) %v217_v1, 8 }
 0x433   :  { %v258_v5 = vpop.permute.xlu0 %257 }
 0x4c8   :  { %v236_v3 = vpop.trf.xlu1 }
 0x4c9   :  { %v260_v4 = vperm.slane %v236_v3, 0 }
 0x4cb   :  { %v261_v6 = vadd.f32 %v260_v4, %v254_v2  ;;  %v262_v7 = vadd.f32 %v260_v4, %v258_v5 }
 0x4cd   :  { %v263_v8 = vmul.f32 0.2, %v261_v6  ;;  %v264_v9 = vmul.f32 0.2, %v262_v7 }
 0x4cf   :  { %v265_v10 = vmax.f32 %v261_v6, %v263_v8  ;;  %v266_v11 = vmax.f32 %v262_v7, %v264_v9 }
 0x4d1   :  { %v267_v13 = vadd.f32 %v359_v18, %v265_v10  ;;  %v268_v14 = vadd.f32 %v360_v17, %v266_v11 }
 0x4d3   :  { %v269_v15 = vsel %vm43_vm0, %v267_v13, -inf  ;;  %v272_v16 = vsel %vm43_vm0, %v268_v14, -inf }
 0x4d4   :  { %270 = vmax.xlane.f32.xlu0 %v269_v15  ;;  %273 = vmax.xlane.f32.xlu2 %v272_v16 }
 0x4e8   :  { %297 = vrot.lane.b32.xlu0 %v207_v61, %s394_s3 }
 0x547   :  { %v274_v19 = vpop.xlane.xlu2 %273  ;;  %v271_v20 = vpop.xlane.xlu0 %270 }
 0x548   :  { %v275_v21 = vmax.f32 %v271_v20, -10000.0  ;;  %v276_v22 = vmax.f32 %v274_v19, -10000.0 }
 0x54a   :  { %v277_v23 = vsub.f32 %v267_v13, %v275_v21  ;;  %v278_v25 = vsub.f32 %v268_v14, %v276_v22 }
 0x54c   :  { %v279_v24 = vmul.f32 1.442695, %v277_v23  ;;  %v281_v18 = vmul.f32 1.442695, %v278_v25 }
 0x54e   :  { %381 = vpow2.f32 %v279_v24 }
 0x54f   :  { %383 = vpow2.f32 %v281_v18 }
 0x554   :  { %v382_v26 = vpop.eup %381 }
 0x555   :  { %v283_v12 = vsel %vm43_vm0, %v382_v26, 0.0  ;;  %v384_v17 = vpop.eup %383 }
 0x556   :  { %284 = vadd.xlane.f32.xlu2 %v283_v12  ;;  %v286_v27 = vsel %vm43_vm0, %v384_v17, 0.0 }
 0x55a   :  { %v298_v38 = vpop.permute.xlu0 %297 }
 0x55e   :  { %287 = vadd.xlane.f32.xlu2 %v286_v27 }
 0x576   :  { %299 = vrot.lane.b32.xlu2 %v209_v62, %s394_s3 }
 0x5c9   :  { %v285_v28 = vpop.xlane.xlu2 %284 }
 0x5ca   :  { %v289_v29 = vadd.f32 1e-16, %v285_v28 }
 0x5cc   :  { %385 = vrcp.f32 %v289_v29 }
 0x5d1   :  { %v288_v30 = vpop.xlane.xlu2 %287 }
 0x5d2   :  { %v290_v31 = vadd.f32 1e-16, %v288_v30  ;;  %v386_v32 = vpop.eup %385 }
 0x5d3   :  { %v293_v34 = vmul.f32 %v386_v32, %v382_v26 }
 0x5d4   :  { %387 = vrcp.f32 %v290_v31 }
 0x5d9   :  { %v300_v42 = vpop.permute.xlu2 %299 }
 0x5da   :  { %v388_v33 = vpop.eup %387 }
 0x5db   :  { %v294_v35 = vmul.f32 %v388_v33, %v384_v17 }
 0x5dd   :  { %v295_v36 = vpack.c.bf16 %v294_v35, %v293_v34 }
 0x5df   :  { %352 = vmatmul.msk.bf16.vlgmr.msra.gmra.mxu3 %vm43_vm0, %v295_v36 }
 0x662   :  { %v315_v39 = vpop.f32.mrf.mxu3 }
 0x663   :  { %v316_v40 = vadd.f32 %v315_v39, %v298_v38 }
 0x665   :  { %v324_v41 = vadd.f32 %v372_v37, %v316_v40 }
 0x667   :  { %327 = vst.msk [vmem:[%s486_s6] sm:$0xff] %vm326_vm2, %v324_v41 }
 0x66a   :  { %v317_v43 = vpop.f32.mrf.mxu3 }
 0x66b   :  { %v318_v44 = vadd.f32 %v317_v43, %v300_v42 }
 0x66d   :  { %v325_v45 = vadd.f32 %v372_v37, %v318_v44 }
 0x66f   :  { %328 = vst.msk [vmem:[%s486_s6 + $0x8] sm:$0xff] %vm326_vm2, %v325_v45 }

</bundles_post_ra>
